<compile_context>
chip_gen: v5e
topology: v5e:2x2
jax: 0.10.0
libtpu: 0.0.40
codegen_flags: <defaults>
</compile_context>

<pallas_src>
import functools
import math

import jax
import jax.numpy as jnp
from jax import lax
from jax.experimental import pallas as pl
from jax.experimental.pallas import tpu as pltpu

_INV_SQRT2 = 1.0 / math.sqrt(2.0)
_MIB = 1024 * 1024


def _round_up(a, b):
    return (a + b - 1) // b * b


def _vmem_capacity_bytes():
    """Physical VMEM per TensorCore; conservative 64 MiB (v7x) fallback."""
    try:
        return int(pltpu.get_tpu_info().vmem_capacity_bytes)
    except Exception:
        return 64 * _MIB


def _device_kind():
    try:
        return jax.devices()[0].device_kind.lower()
    except Exception:
        return ""


def _gelu(h, approximate):
    if approximate:
        # tanh-approx routes the transcendental through the EUP (idle slot on
        # v6e/v7x). Default is exact erf to match torch.nn.GELU().
        return jax.nn.gelu(h, approximate=True)
    return 0.5 * h * (1.0 + lax.erf(h * _INV_SQRT2))


# ----------------------------------------------------------------------------
# Kernels
# ----------------------------------------------------------------------------
def _ffn_kernel_single(x_ref, w1_ref, b1_ref, w2_ref, b2_ref, o_ref, *,
                       approximate):
    """d_ff axis collapsed: weights VMEM-resident, one fused pass, no scratch."""
    h = jnp.dot(x_ref[...], w1_ref[...], preferred_element_type=jnp.float32)
    h = _gelu(h + b1_ref[...], approximate)
    y = jnp.dot(h.astype(w2_ref.dtype), w2_ref[...],
                preferred_element_type=jnp.float32)
    o_ref[...] = (y + b2_ref[...]).astype(o_ref.dtype)


def _ffn_kernel_acc_out(x_ref, w1_ref, b1_ref, w2_ref, b2_ref, o_ref, *,
                        approximate):
    """d_ff chunked, f32 output: accumulate partial fc2 sums directly in o_ref."""
    k = pl.program_id(1)

    @pl.when(k == 0)
    def _init():
        o_ref[...] = jnp.zeros_like(o_ref)

    h = jnp.dot(x_ref[...], w1_ref[...], preferred_element_type=jnp.float32)
    h = _gelu(h + b1_ref[...], approximate)
    o_ref[...] += jnp.dot(h.astype(w2_ref.dtype), w2_ref[...],
                          preferred_element_type=jnp.float32)

    @pl.when(k == pl.num_programs(1) - 1)
    def _finalize():
        o_ref[...] += b2_ref[...]


def _ffn_kernel_scratch(x_ref, w1_ref, b1_ref, w2_ref, b2_ref, o_ref, acc_ref,
                        *, approximate):
    """d_ff chunked, non-f32 output: f32 VMEM accumulator, cast at the end."""
    k = pl.program_id(1)

    @pl.when(k == 0)
    def _init():
        acc_ref[...] = jnp.zeros_like(acc_ref)

    h = jnp.dot(x_ref[...], w1_ref[...], preferred_element_type=jnp.float32)
    h = _gelu(h + b1_ref[...], approximate)
    acc_ref[...] += jnp.dot(h.astype(w2_ref.dtype), w2_ref[...],
                            preferred_element_type=jnp.float32)

    @pl.when(k == pl.num_programs(1) - 1)
    def _finalize():
        o_ref[...] = (acc_ref[...] + b2_ref[...]).astype(o_ref.dtype)


# ----------------------------------------------------------------------------
# Parameter prep (one-time) and tiling heuristics
# ----------------------------------------------------------------------------
def prepare_ffn_params(w1, b1, w2, b2, *, compute_dtype=jnp.bfloat16, tf=512,
                       force_tf=None):
    """One-time parameter prep — keep the result, do NOT redo per forward call.

    PyTorch nn.Linear layout in: w1 (d_ff, d_model), b1 (d_ff,),
    w2 (d_model, d_ff), b2 (d_model,). Transposes to matmul layout, casts the
    matmul operands to `compute_dtype`, zero-pads feature dims to lane
    multiples, and decides whether the d_ff reduction axis can collapse
    (weights fully VMEM-resident -> DMA'd from HBM exactly once).
    """
    d_ff, d_model = w1.shape
    cb = jnp.dtype(compute_dtype).itemsize
    dm_p = _round_up(d_model, 128)
    dff_p128 = _round_up(d_ff, 128)

    if force_tf is not None:
        tf = max(128, min(_round_up(force_tf, 128), dff_p128))
    else:
        vmem_cap = _vmem_capacity_bytes()
        # Both (padded) weight matrices, double-buffered, within half of VMEM:
        # collapse the d_ff chunking entirely.
        weights_resident = 2 * (2 * dm_p * dff_p128 * cb) <= vmem_cap // 2
        if weights_resident:
            tf = dff_p128
        else:
            tf = max(128, min(_round_up(tf, 128), dff_p128))
    dff_p = _round_up(d_ff, tf)

    w1_t = jnp.pad(w1.T.astype(compute_dtype),
                   ((0, dm_p - d_model), (0, dff_p - d_ff)))      # (dm_p, dff_p)
    w2_t = jnp.pad(w2.T.astype(compute_dtype),
                   ((0, dff_p - d_ff), (0, dm_p - d_model)))      # (dff_p, dm_p)
    b1_p = jnp.pad(b1.astype(jnp.float32), (0, dff_p - d_ff)).reshape(1, dff_p)
    b2_p = jnp.pad(b2.astype(jnp.float32), (0, dm_p - d_model)).reshape(1, dm_p)

    return dict(w1_t=w1_t, b1=b1_p, w2_t=w2_t, b2=b2_p,
                d_model=d_model, d_ff=d_ff, tf=tf,
                compute_dtype=compute_dtype)


def _working_set_bytes(tm, tf, dm_p, cb, ob, use_scratch):
    est = 2 * (tm * dm_p * cb        # x tile (double-buffered)
               + dm_p * tf * cb      # w1 chunk
               + 8 * tf * 4          # b1 chunk (sublane-padded, f32)
               + tf * dm_p * cb      # w2 chunk
               + 8 * dm_p * 4        # b2
               + tm * dm_p * ob)     # output tile
    est += tm * tf * (4 + cb)        # f32 hidden h + its compute-dtype copy
    if use_scratch:
        est += tm * dm_p * 4         # f32 accumulator scratch
    return est


def _pick_row_tile(M, tf, dm_p, cb, ob, use_scratch, vmem_cap, k_collapsed):
    kind = _device_kind()
    if "v6" in kind:
        tm = 768          # v6e: ~680 flop/byte HBM roofline, 128 MiB VMEM
    elif "v5" in kind:
        tm = 512          # v5e: ~240 flop/byte, multiple of 128
    else:
        tm = 512          # v7x (and unknown): ~311 flop/byte, 64 MiB VMEM

    # Small-M clamp; floor 16 keeps bf16 tiles fully sublane-packed.
    tm = max(16, min(tm, _round_up(M, 16)))

    # Resident-weight case: weights are fetched once regardless of the number
    # of row tiles, so split medium M into >=2 'parallel' programs to keep
    # v7x's second TensorCore busy.
    if k_collapsed and M > 256 and _round_up(M, 16) <= tm:
        tm = max(128, _round_up((M + 1) // 2, 128))

    # Shrink until the working set fits in ~70% of physical VMEM.
    budget = int(0.70 * vmem_cap)
    while tm > 128 and _working_set_bytes(tm, tf, dm_p, cb, ob, use_scratch) > budget:
        tm -= 128
    return tm


# ----------------------------------------------------------------------------
# Forward
# ----------------------------------------------------------------------------
def poswise_ffn(x, params, *, tm=None, approximate_gelu=False):
    """x: (..., d_model) -> (..., d_model); params from prepare_ffn_params."""
    d_model = params["d_model"]
    tf = params["tf"]
    compute_dtype = params["compute_dtype"]
    w1_t, b1, w2_t, b2 = params["w1_t"], params["b1"], params["w2_t"], params["b2"]
    dm_p, dff_p = w1_t.shape

    orig_shape = x.shape
    out_dtype = x.dtype
    x2 = x.reshape(-1, d_model)
    M = x2.shape[0]

    cb = jnp.dtype(compute_dtype).itemsize
    ob = jnp.dtype(out_dtype).itemsize
    vmem_cap = _vmem_capacity_bytes()

    k_collapsed = (tf == dff_p)
    acc_into_out = (not k_collapsed) and (out_dtype == jnp.float32)
    use_scratch = (not k_collapsed) and (not acc_into_out)

    if tm is None:
        tm = _pick_row_tile(M, tf, dm_p, cb, ob, use_scratch, vmem_cap,
                            k_collapsed)
    else:
        tm = max(16, min(_round_up(tm, 16), _round_up(M, 16)))
    M_p = _round_up(M, tm)

    xp = jnp.pad(x2.astype(compute_dtype),
                 ((0, M_p - M), (0, dm_p - d_model)))

    est = _working_set_bytes(tm, tf, dm_p, cb, ob, use_scratch)
    hard_cap = int(0.75 * vmem_cap)           # never above physical VMEM (v7x: 64 MiB)
    vmem_limit = min(max(32 * _MIB, int(1.3 * est) + 2 * _MIB), hard_cap)

    if k_collapsed:
        grid = (M_p // tm,)
        kernel = functools.partial(_ffn_kernel_single,
                                   approximate=approximate_gelu)
        in_specs = [
            pl.BlockSpec((tm, dm_p), lambda i: (i, 0)),       # x rows
            pl.BlockSpec((dm_p, dff_p), lambda i: (0, 0)),    # w1^T (resident)
            pl.BlockSpec((1, dff_p), lambda i: (0, 0)),       # b1
            pl.BlockSpec((dff_p, dm_p), lambda i: (0, 0)),    # w2^T (resident)
            pl.BlockSpec((1, dm_p), lambda i: (0, 0)),        # b2
        ]
        out_specs = pl.BlockSpec((tm, dm_p), lambda i: (i, 0))
        scratch_shapes = []
        dims = ("parallel",)
    else:
        grid = (M_p // tm, dff_p // tf)
        if acc_into_out:
            kernel = functools.partial(_ffn_kernel_acc_out,
                                       approximate=approximate_gelu)
            scratch_shapes = []
        else:
            kernel = functools.partial(_ffn_kernel_scratch,
                                       approximate=approximate_gelu)
            scratch_shapes = [pltpu.VMEM((tm, dm_p), jnp.float32)]
        in_specs = [
            pl.BlockSpec((tm, dm_p), lambda i, k: (i, 0)),    # x rows
            pl.BlockSpec((dm_p, tf), lambda i, k: (0, k)),    # w1^T chunk
            pl.BlockSpec((1, tf), lambda i, k: (0, k)),       # b1 chunk
            pl.BlockSpec((tf, dm_p), lambda i, k: (k, 0)),    # w2^T chunk
            pl.BlockSpec((1, dm_p), lambda i, k: (0, 0)),     # b2
        ]
        out_specs = pl.BlockSpec((tm, dm_p), lambda i, k: (i, 0))
        dims = ("parallel", "arbitrary")

    out = pl.pallas_call(
        kernel,
        out_shape=jax.ShapeDtypeStruct((M_p, dm_p), out_dtype),
        grid=grid,
        in_specs=in_specs,
        out_specs=out_specs,
        scratch_shapes=scratch_shapes,
        compiler_params=pltpu.CompilerParams(
            dimension_semantics=dims,
            vmem_limit_bytes=int(vmem_limit)),
    )(xp, w1_t, b1, w2_t, b2)

    return out[:M, :d_model].reshape(orig_shape)


# ----------------------------------------------------------------------------
# Demo / correctness check
# ----------------------------------------------------------------------------
def _init_linear(key, out_features, in_features):
    # Deterministic init mimicking nn.Linear's uniform(-1/sqrt(fan_in), ...).
    kw, kb = jax.random.split(key)
    bound = 1.0 / math.sqrt(in_features)
    w = jax.random.uniform(kw, (out_features, in_features), jnp.float32,
                           -bound, bound)
    b = jax.random.uniform(kb, (out_features,), jnp.float32, -bound, bound)
    return w, b


def _reference(x, w1, b1, w2, b2):
    h = x @ w1.T + b1
    h = 0.5 * h * (1.0 + lax.erf(h * _INV_SQRT2))
    return h @ w2.T + b2


if __name__ == "__main__":
    key = jax.random.PRNGKey(0)
    k_x, k_fc1, k_fc2, k_x2, k_fc3, k_fc4 = jax.random.split(key, 6)

    # --- Test 1: small shapes, weights VMEM-resident (collapsed-k path) -----
    batch, seq, d_model, d_ff = 2, 8, 32, 64
    x = jax.random.normal(k_x, (batch, seq, d_model), jnp.float32)
    w1, b1 = _init_linear(k_fc1, d_ff, d_model)   # fc1: d_model -> d_ff
    w2, b2 = _init_linear(k_fc2, d_model, d_ff)   # fc2: d_ff -> d_model

    params = prepare_ffn_params(w1, b1, w2, b2, compute_dtype=jnp.bfloat16)
    y = poswise_ffn(x, params)
    jax.block_until_ready(y)
    assert y.shape == x.shape and y.dtype == x.dtype

    y_ref = _reference(x, w1, b1, w2, b2)
    err = jnp.max(jnp.abs(y - y_ref))
    assert jnp.allclose(y, y_ref, atol=3e-2, rtol=3e-2), f"collapsed path: {err}"

    # --- Test 2: forced d_ff chunking, f32 output (accumulate-into-o_ref) ---
    d_model2, d_ff2 = 32, 256
    x2 = jax.random.normal(k_x2, (batch, seq, d_model2), jnp.float32)
    w1b, b1b = _init_linear(k_fc3, d_ff2, d_model2)
    w2b, b2b = _init_linear(k_fc4, d_model2, d_ff2)
    params2 = prepare_ffn_params(w1b, b1b, w2b, b2b,
                                 compute_dtype=jnp.bfloat16, force_tf=128)
    y2 = poswise_ffn(x2, params2)
    jax.block_until_ready(y2)
    y2_ref = _reference(x2, w1b, b1b, w2b, b2b)
    err2 = jnp.max(jnp.abs(y2 - y2_ref))
    assert jnp.allclose(y2, y2_ref, atol=3e-2, rtol=3e-2), f"chunked f32 path: {err2}"

    # --- Test 3: forced chunking with bf16 activations (scratch-acc path) ---
    x3 = x2.astype(jnp.bfloat16)
    y3 = poswise_ffn(x3, params2)
    jax.block_until_ready(y3)
    assert y3.dtype == jnp.bfloat16
    err3 = jnp.max(jnp.abs(y3.astype(jnp.float32) - y2_ref))
    assert jnp.allclose(y3.astype(jnp.float32), y2_ref, atol=5e-2, rtol=5e-2), \
        f"chunked bf16 path: {err3}"

    print("KERNEL_OK")
</pallas_src>

<mosaic_0001>
module attributes {stable_mosaic.version = 11 : i64} {
  func.func @_ffn_kernel_single(%arg0: i32, %arg1: memref<16x128xbf16, #tpu.memory_space<vmem>>, %arg2: memref<128x128xbf16, #tpu.memory_space<vmem>>, %arg3: memref<1x128xf32, #tpu.memory_space<vmem>>, %arg4: memref<128x128xbf16, #tpu.memory_space<vmem>>, %arg5: memref<1x128xf32, #tpu.memory_space<vmem>>, %arg6: memref<16x128xf32, #tpu.memory_space<vmem>>) attributes {dimension_semantics = [#tpu.dimension_semantics<parallel>], iteration_bounds = array<i64: 1>, scalar_prefetch = 0 : i64, scratch_operands = 0 : i64, tpu.core_type = #tpu.core_type<tc>, window_params = [{transform_indices = @transform_0, window_bounds = array<i64: 16, 128>}, {pipeline_mode = #tpu.pipeline_mode<synchronous>, transform_indices = @transform_1, window_bounds = array<i64: 128, 128>}, {pipeline_mode = #tpu.pipeline_mode<synchronous>, transform_indices = @transform_2, window_bounds = array<i64: 1, 128>}, {pipeline_mode = #tpu.pipeline_mode<synchronous>, transform_indices = @transform_3, window_bounds = array<i64: 128, 128>}, {pipeline_mode = #tpu.pipeline_mode<synchronous>, transform_indices = @transform_4, window_bounds = array<i64: 1, 128>}, {transform_indices = @transform_5, window_bounds = array<i64: 16, 128>}]} {
    %c0 = arith.constant 0 : index
    %c0_0 = arith.constant 0 : index
    %0 = vector.load %arg1[%c0, %c0_0] : memref<16x128xbf16, #tpu.memory_space<vmem>>, vector<16x128xbf16>
    %c0_1 = arith.constant 0 : index
    %c0_2 = arith.constant 0 : index
    %1 = vector.load %arg2[%c0_1, %c0_2] : memref<128x128xbf16, #tpu.memory_space<vmem>>, vector<128x128xbf16>
    %cst = arith.constant dense<0.000000e+00> : vector<16x128xf32>
    %2 = tpu.matmul %0, %1, %cst {dimension_numbers = #tpu.dot_dimension_numbers<[1], [0], [0], [1], [0, 0, 1, 1], [], []>} : vector<16x128xbf16>, vector<128x128xbf16>, vector<16x128xf32> -> vector<16x128xf32>
    %c0_3 = arith.constant 0 : index
    %c0_4 = arith.constant 0 : index
    %3 = vector.load %arg3[%c0_3, %c0_4] : memref<1x128xf32, #tpu.memory_space<vmem>>, vector<1x128xf32>
    %4 = vector.broadcast %3 : vector<1x128xf32> to vector<16x128xf32>
    %5 = arith.addf %2, %4 : vector<16x128xf32>
    %cst_5 = arith.constant 5.000000e-01 : f32
    %6 = vector.broadcast %cst_5 : f32 to vector<16x128xf32>
    %7 = arith.mulf %6, %5 : vector<16x128xf32>
    %cst_6 = arith.constant 0.707106769 : f32
    %8 = vector.broadcast %cst_6 : f32 to vector<16x128xf32>
    %9 = arith.mulf %5, %8 : vector<16x128xf32>
    %10 = math.erf %9 : vector<16x128xf32>
    %cst_7 = arith.constant 1.000000e+00 : f32
    %11 = vector.broadcast %cst_7 : f32 to vector<16x128xf32>
    %12 = arith.addf %11, %10 : vector<16x128xf32>
    %13 = arith.mulf %7, %12 : vector<16x128xf32>
    %14 = arith.truncf %13 : vector<16x128xf32> to vector<16x128xbf16>
    %c0_8 = arith.constant 0 : index
    %c0_9 = arith.constant 0 : index
    %15 = vector.load %arg4[%c0_8, %c0_9] : memref<128x128xbf16, #tpu.memory_space<vmem>>, vector<128x128xbf16>
    %cst_10 = arith.constant dense<0.000000e+00> : vector<16x128xf32>
    %16 = tpu.matmul %14, %15, %cst_10 {dimension_numbers = #tpu.dot_dimension_numbers<[1], [0], [0], [1], [0, 0, 1, 1], [], []>} : vector<16x128xbf16>, vector<128x128xbf16>, vector<16x128xf32> -> vector<16x128xf32>
    %c0_11 = arith.constant 0 : index
    %c0_12 = arith.constant 0 : index
    %17 = vector.load %arg5[%c0_11, %c0_12] : memref<1x128xf32, #tpu.memory_space<vmem>>, vector<1x128xf32>
    %18 = vector.broadcast %17 : vector<1x128xf32> to vector<16x128xf32>
    %19 = arith.addf %16, %18 : vector<16x128xf32>
    %c0_13 = arith.constant 0 : index
    %c0_14 = arith.constant 0 : index
    %20 = vector.load %arg6[%c0_13, %c0_14] : memref<16x128xf32, #tpu.memory_space<vmem>>, vector<16x128xf32>
    tpu.vector_store %arg6[%c0_13, %c0_14], %19 {strides = array<i32>} : memref<16x128xf32, #tpu.memory_space<vmem>>, vector<16x128xf32>,
    return
  }
  func.func @transform_0(%arg0: i32) -> (i32, i32) {
    %c0_i32 = arith.constant 0 : i32
    %c0_i32_0 = arith.constant 0 : i32
    return %arg0, %c0_i32 : i32, i32
  }
  func.func @transform_1(%arg0: i32) -> (i32, i32) {
    %c0_i32 = arith.constant 0 : i32
    %c0_i32_0 = arith.constant 0 : i32
    %c0_i32_1 = arith.constant 0 : i32
    return %c0_i32, %c0_i32_0 : i32, i32
  }
  func.func @transform_2(%arg0: i32) -> (i32, i32) {
    %c0_i32 = arith.constant 0 : i32
    %c0_i32_0 = arith.constant 0 : i32
    %c0_i32_1 = arith.constant 0 : i32
    return %c0_i32, %c0_i32_0 : i32, i32
  }
  func.func @transform_3(%arg0: i32) -> (i32, i32) {
    %c0_i32 = arith.constant 0 : i32
    %c0_i32_0 = arith.constant 0 : i32
    %c0_i32_1 = arith.constant 0 : i32
    return %c0_i32, %c0_i32_0 : i32, i32
  }
  func.func @transform_4(%arg0: i32) -> (i32, i32) {
    %c0_i32 = arith.constant 0 : i32
    %c0_i32_0 = arith.constant 0 : i32
    %c0_i32_1 = arith.constant 0 : i32
    return %c0_i32, %c0_i32_0 : i32, i32
  }
  func.func @transform_5(%arg0: i32) -> (i32, i32) {
    %c0_i32 = arith.constant 0 : i32
    %c0_i32_0 = arith.constant 0 : i32
    return %arg0, %c0_i32 : i32, i32
  }
}

</mosaic_0001>

<bundles_post_ra>
// kernel: tpu_custom_call.1
= control target key start
LH: loop header
LB: loop body
LE: loop exit
PB: predicated region body
PF: predicated region fallthrough
CT: control target
= control target key end

     0   :  { %10 = vsyncpa [#allocation3], 0  ;;  %s628_s0 = inlined_call_operand.hbm [shape: bf16[16,128], index: 0, kind: input, shape index: {}]   ;;  %s629_s1 = inlined_call_operand.hbm [shape: bf16[128,128], index: 1, kind: input, shape index: {}]   ;;  %s630_s2 = inlined_call_operand.vmem [shape: f32[1,128], index: 2, kind: input, shape index: {}]   ;;  %s631_s3 = inlined_call_operand.hbm [shape: bf16[128,128], index: 3, kind: input, shape index: {}]   ;;  %s632_s4 = inlined_call_operand.vmem [shape: f32[1,128], index: 4, kind: input, shape index: {}]   ;;  %s633_s5 = inlined_call_operand.hbm [shape: f32[16,128], index: 5, kind: output, shape index: {}]  }
   0x1   :  { %11 = vsyncpa [#allocation6], 0 }
   0x2   :  { %12 = vsyncpa [#allocation4], 0  ;;  %s30_s20 = sshll.u32 %s629_s1, 4  ;;  %s554_s21 = smov [#allocation5]   ;;  %s31_s20 = int_to_ptr.hbm [resolvable:$true] %s30_s20 }
   0x3   :  { %s32_s22 = sshll.u32 %s554_s21, 4  ;;  %s17_s25 = sshll.u32 %s628_s0, 4  ;;  %s33_s22 = int_to_ptr.vmem [resolvable:$true] %s32_s22  ;;  %s18_s25 = int_to_ptr.hbm [resolvable:$true] %s17_s25 }
   0x4   :  { %s555_s26 = smov 64   ;;  %s556_s27 = smov 4  }
   0x5   :  { %38 = dma.hbm_to_vmem [thread:$0]  %s31_s20, 1024, %s33_s22, [#allocation6], %s555_s26, %s555_s26, %s556_s27  }
   0x6   :  { %s557_s28 = smov [#allocation2]   ;;  %s45_s7 = sshll.u32 %s631_s3, 4  ;;  %s46_s7 = int_to_ptr.hbm [resolvable:$true] %s45_s7 }
   0x7   :  { %s19_s29 = sshll.u32 %s557_s28, 4  ;;  %s558_s1 = smov [#allocation7]   ;;  %s20_s29 = int_to_ptr.vmem [resolvable:$true] %s19_s29 }
   0x8   :  { %25 = dma.hbm_to_vmem [thread:$0]  %s18_s25, 128, %s20_s29, [#allocation3], %s555_s26, %s555_s26, %s556_s27  }
   0x9   :  { %s47_s8 = sshll.u32 %s558_s1, 4  ;;  %s48_s8 = int_to_ptr.vmem [resolvable:$true] %s47_s8 }
   0xa   :  { %53 = dma.hbm_to_vmem [thread:$0]  %s46_s7, 1024, %s48_s8, [#allocation6], %s555_s26, %s555_s26, %s556_s27  }
   0xb   :  { %548 = dma.done.wait [#allocation3], 128  }
   0xc   :  { %549 = vsyncadd [#allocation3], 4294967168 }
   0xd   :  { %550 = dma.done.wait [#allocation6], 2048  }
   0xe   :  { %551 = vsyncadd [#allocation6], 4294965248  ;;  %v429_v0 = vld [vmem:[#allocation5 + $0x38] sm:$0xff]  ;;  %v428_v1 = vld [vmem:[#allocation5 + $0x30] sm:$0xff]  ;;  %s559_s10 = smov [#allocation8]   ;;  %s337_s14 = sshll.u32 %s633_s5, 4  ;;  %s338_s14 = int_to_ptr.hbm [resolvable:$true] %s337_s14 }
   0xf   :  { %144 = vmatpush.bf16.msra.mxu0 %v429_v0  ;;  %v427_v2 = vld [vmem:[#allocation5 + $0x28] sm:$0xff]  ;;  %v426_v3 = vld [vmem:[#allocation5 + $0x20] sm:$0xff]  ;;  %v425_v4 = vld [vmem:[#allocation5 + $0x18] sm:$0xff]  ;;  %s335_s11 = sshll.u32 %s559_s10, 4  ;;  %s560_s15 = smov 128   ;;  %s336_s11 = int_to_ptr.vmem [resolvable:$true] %s335_s11 }
  0x10   :  { %v424_v5 = vld [vmem:[#allocation5 + $0x10] sm:$0xff]  ;;  %v423_v6 = vld [vmem:[#allocation5 + $0x8] sm:$0xff]  ;;  %v422_v7 = vld [vmem:[#allocation5] sm:$0xff]  ;;  %s561_s16 = smov 8  }
  0x11   :  { %v421_v8 = vld [vmem:[#allocation2] sm:$0xff]  ;;  %v436_v14 = vld [vmem:[#allocation7 + $0x30] sm:$0xff]  ;;  %v435_v16 = vld [vmem:[#allocation7 + $0x28] sm:$0xff] }
  0x12   :  { %v446_v9 = vld [vmem:[%s630_s2] ss:$0 sm:$0xff]  ;;  %v434_v21 = vld [vmem:[#allocation7 + $0x20] sm:$0xff]  ;;  %v432_v33 = vld [vmem:[#allocation7 + $0x10] sm:$0xff] }
  0x13   :  { %145 = vmatpush.bf16.msra.mxu0 %v428_v1  ;;  %v437_v10 = vld [vmem:[#allocation7 + $0x38] sm:$0xff]  ;;  %v431_v41 = vld [vmem:[#allocation7 + $0x8] sm:$0xff]  ;;  %v430_v48 = vld [vmem:[#allocation7] sm:$0xff] }
  0x14   :  { %315 = vmatpush.bf16.msra.mxu1 %v437_v10  ;;  %v433_v27 = vld [vmem:[#allocation7 + $0x18] sm:$0xff] }
  0x17   :  { %146 = vmatpush.bf16.msra.mxu0 %v427_v2 }
  0x18   :  { %316 = vmatpush.bf16.msra.mxu1 %v436_v14 }
  0x1b   :  { %147 = vmatpush.bf16.msra.mxu0 %v426_v3 }
  0x1c   :  { %317 = vmatpush.bf16.msra.mxu1 %v435_v16 }
  0x1f   :  { %148 = vmatpush.bf16.msra.mxu0 %v425_v4 }
  0x20   :  { %318 = vmatpush.bf16.msra.mxu1 %v434_v21 }
  0x23   :  { %149 = vmatpush.bf16.msra.mxu0 %v424_v5 }
  0x24   :  { %319 = vmatpush.bf16.msra.mxu1 %v433_v27 }
  0x27   :  { %150 = vmatpush.bf16.msra.mxu0 %v423_v6 }
  0x28   :  { %320 = vmatpush.bf16.msra.mxu1 %v432_v33 }
  0x2b   :  { %151 = vmatpush.bf16.msra.mxu0 %v422_v7 }
  0x2c   :  { %321 = vmatpush.bf16.msra.mxu1 %v431_v41 }
  0x2e   :  { %152 = vmatmul.bf16.vlgmr.msra.gmra.mxu0 %v421_v8 }
  0x30   :  { %322 = vmatpush.bf16.msra.mxu1 %v430_v48 }
  0xab   :  { %v153_v11 = vpop.f32.mrf.mxu0 }
  0xac   :  { %v604_v12 = vadd.f32 %v446_v9, %v153_v11 }
  0xae   :  { %v607_v13 = vmul.f32 0.70710677, %v604_v12 }
  0xb0   :  { %v162_v15 = vmul.f32 %v607_v13, %v607_v13 }
  0xb2   :  { %v163_v17 = vmin.f32 %v162_v15, 16.0 }
  0xb3   :  { %v155_v18 = vpop.f32.mrf.mxu0 }
  0xb4   :  { %v164_v19 = vmul.f32 2.1237322e-06, %v163_v17  ;;  %v611_v20 = vadd.f32 %v446_v9, %v155_v18  ;;  %v175_v22 = vmul.f32 3.8918573e-05, %v163_v17 }
  0xb6   :  { %v165_v23 = vadd.f32 0.00028619796, %v164_v19  ;;  %v614_v24 = vmul.f32 0.70710677, %v611_v20  ;;  %v176_v25 = vadd.f32 0.001143296, %v175_v22 }
  0xb8   :  { %v202_v26 = vmul.f32 %v614_v24, %v614_v24  ;;  %v166_v28 = vmul.f32 %v165_v23, %v163_v17  ;;  %v177_v29 = vmul.f32 %v176_v25, %v163_v17 }
  0xba   :  { %v203_v30 = vmin.f32 %v202_v26, 16.0  ;;  %v178_v31 = vadd.f32 0.014752088, %v177_v29  ;;  %v167_v35 = vadd.f32 0.0036580483, %v166_v28 }
  0xbc   :  { %v204_v32 = vmul.f32 2.1237322e-06, %v203_v30  ;;  %v215_v34 = vmul.f32 3.8918573e-05, %v203_v30  ;;  %v179_v36 = vmul.f32 %v178_v31, %v163_v17  ;;  %v168_v43 = vmul.f32 %v167_v35, %v163_v17 }
  0xbd   :  { %v159_v35 = vmul.f32 0.5, %v611_v20 }
  0xbe   :  { %v205_v37 = vadd.f32 0.00028619796, %v204_v32  ;;  %v216_v38 = vadd.f32 0.001143296, %v215_v34  ;;  %v180_v39 = vadd.f32 0.112945676, %v179_v36 }
  0xbf   :  { %v169_v50 = vadd.f32 0.05243302, %v168_v43  ;;  %v158_v34 = vmul.f32 0.5, %v604_v12 }
  0xc0   :  { %v206_v40 = vmul.f32 %v205_v37, %v203_v30  ;;  %v217_v42 = vmul.f32 %v216_v38, %v203_v30  ;;  %v181_v44 = vmul.f32 %v180_v39, %v163_v17 }
  0xc1   :  { %v170_v56 = vmul.f32 %v169_v50, %v163_v17 }
  0xc2   :  { %v207_v45 = vadd.f32 0.0036580483, %v206_v40  ;;  %v218_v46 = vadd.f32 0.014752088, %v217_v42  ;;  %v182_v47 = vadd.f32 0.4994258, %v181_v44 }
  0xc3   :  { %v171_v60 = vadd.f32 0.18741608, %v170_v56 }
  0xc4   :  { %v219_v49 = vmul.f32 %v218_v46, %v203_v30  ;;  %v183_v51 = vmul.f32 %v182_v47, %v163_v17  ;;  %v208_v52 = vmul.f32 %v207_v45, %v203_v30 }
  0xc5   :  { %v172_v1 = vmul.f32 %v171_v60, %v163_v17 }
  0xc6   :  { %v220_v53 = vadd.f32 0.112945676, %v219_v49  ;;  %v184_v54 = vadd.f32 1.0, %v183_v51  ;;  %v209_v57 = vadd.f32 0.05243302, %v208_v52 }
  0xc7   :  { %v173_v7 = vadd.f32 1.1283791, %v172_v1 }
  0xc8   :  { %v221_v55 = vmul.f32 %v220_v53, %v203_v30  ;;  %448 = vrcp.f32 %v184_v54  ;;  %v210_v61 = vmul.f32 %v209_v57, %v203_v30  ;;  %v196_v4 = vand.u32 2147483648, %v184_v54 }
  0xc9   :  { %v194_v6 = vand.u32 2147483647, %v184_v54  ;;  %vm190_vm1 = vweird.f32 %v184_v54  ;;  %v174_v16 = vmul.f32 %v173_v7, %v607_v13 }
  0xca   :  { %v222_v58 = vadd.f32 0.4994258, %v221_v55  ;;  %v211_v2 = vadd.f32 0.18741608, %v210_v61  ;;  %v197_v11 = vor.u32 1.1754944e-38, %v196_v4 }
  0xcb   :  { %vm195_vm3 = vcmp.eq.f32.partialorder %v194_v6, 8.507059e+37 }
  0xcc   :  { %v223_v59 = vmul.f32 %v222_v58, %v203_v30  ;;  %v212_v9 = vmul.f32 %v211_v2, %v203_v30 }
  0xce   :  { %v224_v62 = vadd.f32 1.0, %v223_v59  ;;  %v449_v63 = vpop.eup %448  ;;  %v213_v19 = vadd.f32 1.1283791, %v212_v9 }
  0xcf   :  { %v186_v0 = vmul.f32 %v449_v63, %v184_v54  ;;  %vm191_vm0 = vweird.f32 %v449_v63 }
  0xd0   :  { %450 = vrcp.f32 %v224_v62  ;;  %vm192_vm2 = vmor %vm190_vm1, %vm191_vm0  ;;  %v236_v21 = vand.u32 2147483648, %v224_v62  ;;  %v234_v25 = vand.u32 2147483647, %v224_v62  ;;  %vm230_vm5 = vweird.f32 %v224_v62 }
  0xd1   :  { %v187_v3 = vsub.f32 1.0, %v186_v0  ;;  %v214_v28 = vmul.f32 %v213_v19, %v614_v24  ;;  %v447_v24 = vld [vmem:[%s632_s4] ss:$0 sm:$0xff] }
  0xd2   :  { %v237_v27 = vor.u32 1.1754944e-38, %v236_v21  ;;  %vm235_vm7 = vcmp.eq.f32.partialorder %v234_v25, 8.507059e+37 }
  0xd3   :  { %v188_v5 = vmul.f32 %v449_v63, %v187_v3 }
  0xd5   :  { %v189_v10 = vadd.f32 %v449_v63, %v188_v5 }
  0xd6   :  { %v451_v8 = vpop.eup %450 }
  0xd7   :  { %v226_v14 = vmul.f32 %v451_v8, %v224_v62  ;;  %v193_v15 = vsel %vm192_vm2, %v449_v63, %v189_v10  ;;  %vm231_vm4 = vweird.f32 %v451_v8 }
  0xd8   :  { %v198_v18 = vsel %vm195_vm3, %v197_v11, %v193_v15  ;;  %vm232_vm6 = vmor %vm230_vm5, %vm231_vm4 }
  0xd9   :  { %v227_v17 = vsub.f32 1.0, %v226_v14  ;;  %v199_v22 = vmul.f32 %v198_v18, %v174_v16 }
  0xdb   :  { %v228_v23 = vmul.f32 %v451_v8, %v227_v17  ;;  %v387_v29 = vclamps-f32 %v199_v22, 1.0 }
  0xdd   :  { %v229_v26 = vadd.f32 %v451_v8, %v228_v23  ;;  %v242_v33 = vadd.f32 1.0, %v387_v29 }
  0xdf   :  { %v233_v30 = vsel %vm232_vm6, %v451_v8, %v229_v26  ;;  %v244_v37 = vmul.f32 %v242_v33, %v158_v34 }
  0xe0   :  { %v238_v31 = vsel %vm235_vm7, %v237_v27, %v233_v30 }
  0xe1   :  { %v239_v32 = vmul.f32 %v238_v31, %v214_v28 }
  0xe3   :  { %v388_v13 = vclamps-f32 %v239_v32, 1.0 }
  0xe5   :  { %v243_v36 = vadd.f32 1.0, %v388_v13 }
  0xe7   :  { %v245_v38 = vmul.f32 %v243_v36, %v159_v35 }
  0xe9   :  { %v246_v39 = vpack.c.bf16 %v245_v38, %v244_v37 }
  0xeb   :  { %323 = vmatmul.bf16.vlgmr.msra.gmra.mxu1 %v246_v39 }
 0x168   :  { %v324_v40 = vpop.f32.mrf.mxu1 }
 0x169   :  { %v325_v41 = vadd.f32 %v447_v24, %v324_v40 }
 0x16b   :  { %329 = vst [vmem:[#allocation8] sm:$0xff] %v325_v41 }
 0x170   :  { %v326_v12 = vpop.f32.mrf.mxu1 }
 0x171   :  { %v327_v20 = vadd.f32 %v447_v24, %v326_v12 }
 0x173   :  { %330 = vst [vmem:[#allocation8 + $0x8] sm:$0xff] %v327_v20 }
 0x174   :  { %343 = dma.vmem_to_hbm [thread:$0]  %s336_s11, 256, %s338_s14, [#allocation4], %s560_s15, %s560_s15, %s561_s16  }
 0x175   :  { %552 = dma.done.wait [#allocation4], 256  }
 0x176   :  { %553 = vsyncadd [#allocation4], 4294967040 }
 0x177   :  { %348 = vsyncpa [#allocation3], 1 }
 0x178   :  { %349 = vsyncpa [#allocation6], 1 }
 0x179   :  { %350 = vsyncpa [#allocation4], 1 }

</bundles_post_ra>
